<compile_context>
chip_gen: v5e
topology: v5e:2x2
jax: 0.10.0
libtpu: 0.0.40
codegen_flags: <defaults>
</compile_context>

<pallas_src>
import jax
import jax.numpy as jnp
from jax import lax
from jax.experimental import pallas as pl
from jax.experimental.pallas import tpu as pltpu


_TM_ALIGN = 16  # sublane tile for bf16 (packed); also valid for f32 tiles.


def _round_up(x, m):
    return (x + m - 1) // m * m


def _vmem_budget():
    """Generation-aware (budget, vmem_limit): ~40 MiB scoped on v7x (64 MiB per
    TC), ~80 MiB on v5e/v6e (128 MiB).  Falls back to the conservative v7x
    numbers if the hardware query is unavailable."""
    cap = 64 * 1024 * 1024
    try:
        info_cap = int(getattr(pltpu.get_tpu_info(), "vmem_capacity_bytes"))
        if info_cap > 0:
            cap = info_cap
    except Exception:
        pass
    budget = min(cap * 5 // 8, 96 * 1024 * 1024)
    vmem_limit = min(cap - 8 * 1024 * 1024, budget + 16 * 1024 * 1024)
    vmem_limit = max(vmem_limit, 32 * 1024 * 1024)
    return budget, vmem_limit


def _choose_tile_m(m, kp, cp, out_bytes, budget):
    # Resident operands (double-buffered by default): weight + scale + bias.
    fixed = 2 * kp * cp * 2 + 2 * 2 * cp * 4
    # Per output row: double-buffered bf16 patch tile + double-buffered output
    # tile + the f32 accumulator the matmul produces before the dtype cast.
    per_row = 2 * kp * 2 + 2 * cp * out_bytes + cp * 4
    avail = max(budget - fixed, _TM_ALIGN * per_row)
    tm = min(avail // per_row, 2048, _round_up(m, _TM_ALIGN))
    if m > _TM_ALIGN:
        # v7x megacore: guarantee the M grid splits into at least 2 tiles.
        tm = min(tm, _round_up(-(-m // 2), _TM_ALIGN))
    return max(_TM_ALIGN, (int(tm) // _TM_ALIGN) * _TM_ALIGN)


def _conv_down_kernel(p_ref, w_ref, scale_ref, bias_ref, o_ref):
    # p_ref:     (TM, Kp) bf16 im2col patch tile (streamed over the M grid)
    # w_ref:     (Kp, Cp) bf16 conv weight, rows in (kh, kw, cin) order (resident)
    # scale_ref: (1, Cp)  f32 BN scale = gamma / sqrt(var + eps)
    # bias_ref:  (1, Cp)  f32 folded bias = (conv_b - mean) * scale + beta
    # o_ref:     (TM, Cp) output tile (bf16 by default)
    acc = jnp.dot(p_ref[...], w_ref[...], preferred_element_type=jnp.float32)
    y = acc * scale_ref[...] + bias_ref[...]      # BN scale/shift in f32 (VPU)
    o_ref[...] = jnp.maximum(y, 0.0).astype(o_ref.dtype)   # ReLU, store bf16


def conv_down(x_nchw, w, b, gamma, beta, running_mean, running_var,
              eps=1e-5, tile_m=None, out_dtype=jnp.bfloat16,
              channels_last=False):
    """Equivalent of ConvDown(in_ch, out_ch, 'relu').forward(x) (eval-mode BN)."""
    N, Cin, H, W = x_nchw.shape
    Cout = w.shape[0]
    kH = kW = 5
    stride = 2
    pad = 1
    Hout = (H + 2 * pad - kH) // stride + 1
    Wout = (W + 2 * pad - kW) // stride + 1

    # ---- glue: NCHW -> NHWC, zero-pad, bf16.  im2col is built as 25 strided
    # slices concatenated on the LAST axis, so K order = (kh, kw, cin) and the
    # final reshape to (M, K) is a free bitcast (no 6-D transpose pass).
    xh = jnp.pad(x_nchw.transpose(0, 2, 3, 1).astype(jnp.bfloat16),
                 ((0, 0), (pad, pad), (pad, pad), (0, 0)))
    taps = []
    for kh in range(kH):
        for kw in range(kW):
            taps.append(
                xh[:,
                   kh:kh + stride * (Hout - 1) + 1:stride,
                   kw:kw + stride * (Wout - 1) + 1:stride, :])
    patches = jnp.concatenate(taps, axis=-1).reshape(
        N * Hout * Wout, kH * kW * Cin)
    M, K = patches.shape

    # Weight rows permuted to the (kh, kw, cin) order (tiny tensor, free).
    # BN scale is NOT folded into the bf16 weight; it is applied in f32 in the
    # kernel epilogue for better accuracy at zero wall-clock cost.
    w_mat = w.transpose(2, 3, 1, 0).reshape(K, Cout).astype(jnp.bfloat16)
    scale = (gamma / jnp.sqrt(running_var + eps)).astype(jnp.float32)
    bias = ((b - running_mean) * scale + beta).astype(jnp.float32)

    out_bytes = jnp.dtype(out_dtype).itemsize

    # ---- padding: Cout lane-dense (256-multiple when >= 192 for the 2x256
    # MXU of v6e/v7x, else 128); K only to a multiple of 8 (sublane alignment),
    # blocks then use the full K extent and Mosaic pads lanes internally.
    if Cout >= 192:
        Cp = _round_up(Cout, 256)
    else:
        Cp = _round_up(max(Cout, 128), 128)
    Kp = _round_up(K, 8)

    budget, vmem_limit = _vmem_budget()
    if tile_m is not None:
        TM = max(_TM_ALIGN, (int(tile_m) // _TM_ALIGN) * _TM_ALIGN)
    else:
        TM = _choose_tile_m(M, Kp, Cp, out_bytes, budget)

    grid_m = -(-M // TM)
    if grid_m > 1 and grid_m % 2 == 1:
        grid_m += 1        # even tile count keeps v7x's two TensorCores balanced
    Mp = grid_m * TM

    patches_p = jnp.pad(patches, ((0, Mp - M), (0, Kp - K)))
    w_p = jnp.pad(w_mat, ((0, Kp - K), (0, Cp - Cout)))
    scale_p = jnp.pad(scale, (0, Cp - Cout)).reshape(1, Cp)
    bias_p = jnp.pad(bias, (0, Cp - Cout)).reshape(1, Cp)

    cost = pl.CostEstimate(
        flops=2 * Mp * Kp * Cp,
        transcendentals=0,
        bytes_accessed=patches_p.size * 2 + w_p.size * 2
        + scale_p.size * 4 + bias_p.size * 4 + Mp * Cp * out_bytes)

    out = pl.pallas_call(
        _conv_down_kernel,
        out_shape=jax.ShapeDtypeStruct((Mp, Cp), out_dtype),
        grid_spec=pltpu.PrefetchScalarGridSpec(
            num_scalar_prefetch=0,
            grid=(grid_m,),
            in_specs=[
                # Streamed patch tile.  (pipeline_mode=pl.Buffered(3) is a
                # follow-up when large Cin forces TM small.)
                pl.BlockSpec((TM, Kp), lambda i: (i, 0)),
                # Resident operands (constant index_map -> fetched once).
                # pipeline_mode=pl.Buffered(1) would free one weight buffer;
                # the VMEM budget above already accounts for two.
                pl.BlockSpec((Kp, Cp), lambda i: (0, 0)),   # weight
                pl.BlockSpec((1, Cp), lambda i: (0, 0)),    # BN scale
                pl.BlockSpec((1, Cp), lambda i: (0, 0)),    # folded bias
            ],
            out_specs=pl.BlockSpec((TM, Cp), lambda i: (i, 0)),
        ),
        compiler_params=pltpu.CompilerParams(
            dimension_semantics=("parallel",),        # megacore shard on v7x
            vmem_limit_bytes=vmem_limit),
        cost_estimate=cost,
    )(patches_p, w_p, scale_p, bias_p)

    # Strip padding.  Output stays in the kernel's dtype (no extra cast pass).
    out = out[:M, :Cout].reshape(N, Hout, Wout, Cout)
    if channels_last:
        return out                       # TPU-native NHWC: no transpose pass
    return out.transpose(0, 3, 1, 2)     # PyTorch NCHW contract


def _reference(x, w, b, gamma, beta, mean, var, eps=1e-5):
    y = lax.conv_general_dilated(
        x, w, window_strides=(2, 2), padding=((1, 1), (1, 1)),
        dimension_numbers=("NCHW", "OIHW", "NCHW"))
    y = y + b[None, :, None, None]
    scale = gamma / jnp.sqrt(var + eps)
    y = (y - mean[None, :, None, None]) * scale[None, :, None, None] \
        + beta[None, :, None, None]
    return jnp.maximum(y, 0.0)


if __name__ == "__main__":
    N, Cin, Cout, H, W = 2, 4, 8, 16, 16

    key = jax.random.PRNGKey(0)
    kx, kw_, kb, kg, kbeta, km, kv = jax.random.split(key, 7)

    x = jax.random.normal(kx, (N, Cin, H, W), dtype=jnp.float32)
    # Conv2d(in_channels=4, out_channels=8, kernel_size=5) params.
    conv_w = 0.1 * jax.random.normal(kw_, (Cout, Cin, 5, 5), dtype=jnp.float32)
    conv_b = 0.1 * jax.random.normal(kb, (Cout,), dtype=jnp.float32)
    # BatchNorm2d(8) params (deterministic, non-trivial).
    bn_gamma = 1.0 + 0.1 * jax.random.normal(kg, (Cout,), dtype=jnp.float32)
    bn_beta = 0.1 * jax.random.normal(kbeta, (Cout,), dtype=jnp.float32)
    bn_mean = 0.1 * jax.random.normal(km, (Cout,), dtype=jnp.float32)
    bn_var = 1.0 + 0.1 * jax.random.uniform(kv, (Cout,), dtype=jnp.float32)

    # M = 2*7*7 = 98 -> auto TM = 64 -> a 2-step (even) M grid without forcing
    # tile_m, so the pipelined multi-tile path is exercised.
    f = jax.jit(conv_down)
    out = jax.block_until_ready(
        f(x, conv_w, conv_b, bn_gamma, bn_beta, bn_mean, bn_var))

    ref = _reference(x, conv_w, conv_b, bn_gamma, bn_beta, bn_mean, bn_var)
    assert out.shape == ref.shape == (N, Cout, 7, 7), out.shape
    assert out.dtype == jnp.bfloat16, out.dtype
    # bf16 MXU operands + bf16 output -> ~1% numerical noise vs the f32 reference.
    out_f32 = out.astype(jnp.float32)
    if not jnp.allclose(out_f32, ref, atol=3e-2, rtol=3e-2):
        err = jnp.max(jnp.abs(out_f32 - ref))
        raise AssertionError(f"Pallas ConvDown mismatch vs reference, max |err|={err}")

    print("KERNEL_OK")
</pallas_src>

<mosaic_0001>
module attributes {stable_mosaic.version = 11 : i64} {
  func.func @_conv_down_kernel(%arg0: i32, %arg1: memref<64x104xbf16, #tpu.memory_space<vmem>>, %arg2: memref<104x128xbf16, #tpu.memory_space<vmem>>, %arg3: memref<1x128xf32, #tpu.memory_space<vmem>>, %arg4: memref<1x128xf32, #tpu.memory_space<vmem>>, %arg5: memref<64x128xbf16, #tpu.memory_space<vmem>>) attributes {dimension_semantics = [#tpu.dimension_semantics<parallel>], iteration_bounds = array<i64: 2>, scalar_prefetch = 0 : i64, scratch_operands = 0 : i64, tpu.core_type = #tpu.core_type<tc>, window_params = [{transform_indices = @transform_0, window_bounds = array<i64: 64, 104>}, {pipeline_mode = #tpu.pipeline_mode<synchronous>, transform_indices = @transform_1, window_bounds = array<i64: 104, 128>}, {pipeline_mode = #tpu.pipeline_mode<synchronous>, transform_indices = @transform_2, window_bounds = array<i64: 1, 128>}, {pipeline_mode = #tpu.pipeline_mode<synchronous>, transform_indices = @transform_3, window_bounds = array<i64: 1, 128>}, {transform_indices = @transform_4, window_bounds = array<i64: 64, 128>}]} {
    %c0 = arith.constant 0 : index
    %c0_0 = arith.constant 0 : index
    %0 = vector.load %arg1[%c0, %c0_0] : memref<64x104xbf16, #tpu.memory_space<vmem>>, vector<64x104xbf16>
    %c0_1 = arith.constant 0 : index
    %c0_2 = arith.constant 0 : index
    %1 = vector.load %arg2[%c0_1, %c0_2] : memref<104x128xbf16, #tpu.memory_space<vmem>>, vector<104x128xbf16>
    %cst = arith.constant dense<0.000000e+00> : vector<64x128xf32>
    %2 = tpu.matmul %0, %1, %cst {dimension_numbers = #tpu.dot_dimension_numbers<[1], [0], [0], [1], [0, 0, 1, 1], [], []>} : vector<64x104xbf16>, vector<104x128xbf16>, vector<64x128xf32> -> vector<64x128xf32>
    %c0_3 = arith.constant 0 : index
    %c0_4 = arith.constant 0 : index
    %3 = vector.load %arg3[%c0_3, %c0_4] : memref<1x128xf32, #tpu.memory_space<vmem>>, vector<1x128xf32>
    %4 = vector.broadcast %3 : vector<1x128xf32> to vector<64x128xf32>
    %5 = arith.mulf %2, %4 : vector<64x128xf32>
    %c0_5 = arith.constant 0 : index
    %c0_6 = arith.constant 0 : index
    %6 = vector.load %arg4[%c0_5, %c0_6] : memref<1x128xf32, #tpu.memory_space<vmem>>, vector<1x128xf32>
    %7 = vector.broadcast %6 : vector<1x128xf32> to vector<64x128xf32>
    %8 = arith.addf %5, %7 : vector<64x128xf32>
    %cst_7 = arith.constant 0.000000e+00 : f32
    %9 = vector.broadcast %cst_7 : f32 to vector<64x128xf32>
    %10 = arith.maximumf %8, %9 : vector<64x128xf32>
    %11 = arith.truncf %10 : vector<64x128xf32> to vector<64x128xbf16>
    %c0_8 = arith.constant 0 : index
    %c0_9 = arith.constant 0 : index
    %12 = vector.load %arg5[%c0_8, %c0_9] : memref<64x128xbf16, #tpu.memory_space<vmem>>, vector<64x128xbf16>
    tpu.vector_store %arg5[%c0_8, %c0_9], %11 {strides = array<i32>} : memref<64x128xbf16, #tpu.memory_space<vmem>>, vector<64x128xbf16>,
    return
  }
  func.func @transform_0(%arg0: i32) -> (i32, i32) {
    %c0_i32 = arith.constant 0 : i32
    %c0_i32_0 = arith.constant 0 : i32
    return %arg0, %c0_i32 : i32, i32
  }
  func.func @transform_1(%arg0: i32) -> (i32, i32) {
    %c0_i32 = arith.constant 0 : i32
    %c0_i32_0 = arith.constant 0 : i32
    %c0_i32_1 = arith.constant 0 : i32
    return %c0_i32, %c0_i32_0 : i32, i32
  }
  func.func @transform_2(%arg0: i32) -> (i32, i32) {
    %c0_i32 = arith.constant 0 : i32
    %c0_i32_0 = arith.constant 0 : i32
    %c0_i32_1 = arith.constant 0 : i32
    return %c0_i32, %c0_i32_0 : i32, i32
  }
  func.func @transform_3(%arg0: i32) -> (i32, i32) {
    %c0_i32 = arith.constant 0 : i32
    %c0_i32_0 = arith.constant 0 : i32
    %c0_i32_1 = arith.constant 0 : i32
    return %c0_i32, %c0_i32_0 : i32, i32
  }
  func.func @transform_4(%arg0: i32) -> (i32, i32) {
    %c0_i32 = arith.constant 0 : i32
    %c0_i32_0 = arith.constant 0 : i32
    return %arg0, %c0_i32 : i32, i32
  }
}

</mosaic_0001>

<bundles_post_ra>
// kernel: conv_down.1
= control target key start
LH: loop header
LB: loop body
LE: loop exit
PB: predicated region body
PF: predicated region fallthrough
CT: control target
= control target key end

     0   :  { %s584_s15 = smov 0   ;;  %s635_s0 = inlined_call_operand.vmem [shape: bf16[128,104], index: 0, kind: input, shape index: {}]   ;;  %s636_s1 = inlined_call_operand.vmem [shape: bf16[104,128], index: 1, kind: input, shape index: {}]   ;;  %s637_s2 = inlined_call_operand.vmem [shape: f32[1,128], index: 2, kind: input, shape index: {}]   ;;  %s638_s3 = inlined_call_operand.vmem [shape: f32[1,128], index: 3, kind: input, shape index: {}]   ;;  %s639_s4 = inlined_call_operand.vmem [shape: bf16[128,128], index: 4, kind: output, shape index: {}]  }
   0x1 LB: > { %s432_s16 = sadd.s32 4294967295, %s557_s15   ;;  %p436_p0 = scmp.ge.s32.totalorder %s557_s15, 1  ;;  %s557_s15 = sphi %s584_s15, %s14_s15  }
   0x2   : > { %p163_p1 = scmp.lt.s32.totalorder %s557_s15, 3 }
   0x4   : > { %p164_p2 = pnand %p436_p0, %p163_p1 }
   0x5   : > { %s437_s23 = sshll.u32 (!%p164_p2), %s432_s16, 3 }
   0x6   : > { %167 = sbr.rel (%p164_p2) target bundleno = 195 (0xc3), region = 36  ;;  %p190_p3 = scmp.lt.s32.totalorder (!%p164_p2), %s437_s23, 15 }
   0xb   : > { %v222_v0 = vld [vmem:[%s636_s1 + $0x30] sm:$0xf]  ;;  %vm295_vm0 = vcmask 1043456   ;;  %v496_v4 = vld [vmem:[%s636_s1 + $0x28] sm:$0xff]  ;;  %v495_v5 = vld [vmem:[%s636_s1 + $0x20] sm:$0xff]  ;;  %s641_s23 = smov (!%p190_p3, %s437_s23), 15 }
   0xc   : > { %v268_v1 = vunpack.c.l.b16 %v222_v0  ;;  %v494_v6 = vld [vmem:[%s636_s1 + $0x18] sm:$0xff]  ;;  %v493_v7 = vld [vmem:[%s636_s1 + $0x10] sm:$0xff]  ;;  %v492_v8 = vld [vmem:[%s636_s1 + $0x8] sm:$0xff]  ;;  %s438_s30 = sshll.u32 %s641_s23, 2  ;;  %vm282_vm1 = vcmask 850944  }
   0xd   : > { %v491_v9 = vld [vmem:[%s636_s1] sm:$0xff]  ;;  %s193_s9 = scalar_lea.vmem %s635_s0, %s438_s30  ;;  %s199_s17 = scalar_lea.vmem %s639_s4, %s438_s30 }
   0xe   : > { %v275_v2 = vpack.c.b16 %v268_v1, %v268_v1  ;;  %v487_v10 = vld [vmem:[%s193_s9] sm:$0xff]  ;;  %v488_v11 = vld [vmem:[%s193_s9 + $0x8] sm:$0xff]  ;;  %v489_v12 = vld [vmem:[%s193_s9 + $0x10] sm:$0xff] }
   0xf   : > { %v490_v13 = vld [vmem:[%s193_s9 + $0x18] sm:$0xff]  ;;  %v549_v16 = vld [vmem:[%s637_s2] ss:$0 sm:$0xff] }
  0x10   : > { %v297_v3 = vsel %vm295_vm0, %v275_v2, 0  ;;  %v550_v18 = vld [vmem:[%s638_s3] ss:$0 sm:$0xff] }
  0x11   : > { %300 = vmatpush.bf16.msra.mxu0 %v297_v3  ;;  %520 = vmatpush.bf16.msra.mxu1 %v297_v3 }
  0x12   : > { %521 = vmatpush.bf16.msra.mxu2 %v297_v3  ;;  %522 = vmatpush.bf16.msra.mxu3 %v297_v3 }
  0x15   : > { %301 = vmatpush.bf16.msra.mxu0 %v496_v4  ;;  %523 = vmatpush.bf16.msra.mxu1 %v496_v4 }
  0x16   : > { %524 = vmatpush.bf16.msra.mxu2 %v496_v4  ;;  %525 = vmatpush.bf16.msra.mxu3 %v496_v4 }
  0x19   : > { %302 = vmatpush.bf16.msra.mxu0 %v495_v5  ;;  %526 = vmatpush.bf16.msra.mxu1 %v495_v5 }
  0x1a   : > { %527 = vmatpush.bf16.msra.mxu2 %v495_v5  ;;  %528 = vmatpush.bf16.msra.mxu3 %v495_v5 }
  0x1d   : > { %303 = vmatpush.bf16.msra.mxu0 %v494_v6  ;;  %529 = vmatpush.bf16.msra.mxu1 %v494_v6 }
  0x1e   : > { %530 = vmatpush.bf16.msra.mxu2 %v494_v6  ;;  %531 = vmatpush.bf16.msra.mxu3 %v494_v6 }
  0x21   : > { %304 = vmatpush.bf16.msra.mxu0 %v493_v7  ;;  %532 = vmatpush.bf16.msra.mxu1 %v493_v7 }
  0x22   : > { %533 = vmatpush.bf16.msra.mxu2 %v493_v7  ;;  %534 = vmatpush.bf16.msra.mxu3 %v493_v7 }
  0x25   : > { %305 = vmatpush.bf16.msra.mxu0 %v492_v8  ;;  %535 = vmatpush.bf16.msra.mxu1 %v492_v8 }
  0x26   : > { %536 = vmatpush.bf16.msra.mxu2 %v492_v8  ;;  %537 = vmatpush.bf16.msra.mxu3 %v492_v8 }
  0x29   : > { %306 = vmatpush.bf16.msra.mxu0 %v491_v9  ;;  %538 = vmatpush.bf16.msra.mxu1 %v491_v9 }
  0x2a   : > { %539 = vmatpush.bf16.msra.mxu2 %v491_v9  ;;  %540 = vmatpush.bf16.msra.mxu3 %v491_v9 }
  0x2c   : > { %481 = vmatmul.msk.bf16.vlgmr.msra.gmra.mxu0 %vm282_vm1, %v487_v10  ;;  %482 = vmatmul.msk.bf16.vlgmr.msra.gmra.mxu1 %vm282_vm1, %v488_v11 }
  0x2d   : > { %483 = vmatmul.msk.bf16.vlgmr.msra.gmra.mxu2 %vm282_vm1, %v489_v12  ;;  %484 = vmatmul.msk.bf16.vlgmr.msra.gmra.mxu3 %vm282_vm1, %v490_v13 }
  0xa9   : > { %v308_v14 = vpop.f32.mrf.mxu0  ;;  %v313_v15 = vpop.f32.mrf.mxu1 }
  0xaa   : > { %v332_v17 = vmul.f32 %v549_v16, %v308_v14  ;;  %v334_v19 = vmul.f32 %v549_v16, %v313_v15 }
  0xac   : > { %v344_v24 = vadd.f32 %v550_v18, %v332_v17  ;;  %v346_v25 = vadd.f32 %v550_v18, %v334_v19 }
  0xae   : > { %v352_v32 = vmax.f32 %v344_v24, 0.0  ;;  %v354_v33 = vmax.f32 %v346_v25, 0.0 }
  0xb0   : > { %v318_v20 = vpop.f32.mrf.mxu2  ;;  %v323_v21 = vpop.f32.mrf.mxu3 }
  0xb1   : > { %v310_v22 = vpop.f32.mrf.mxu0  ;;  %v315_v23 = vpop.f32.mrf.mxu1  ;;  %v336_v30 = vmul.f32 %v549_v16, %v318_v20  ;;  %v338_v31 = vmul.f32 %v549_v16, %v323_v21 }
  0xb2   : > { %v333_v26 = vmul.f32 %v549_v16, %v310_v22  ;;  %v335_v27 = vmul.f32 %v549_v16, %v315_v23 }
  0xb3   : > { %v348_v40 = vadd.f32 %v550_v18, %v336_v30  ;;  %v350_v41 = vadd.f32 %v550_v18, %v338_v31 }
  0xb4   : > { %v345_v28 = vadd.f32 %v550_v18, %v333_v26  ;;  %v347_v29 = vadd.f32 %v550_v18, %v335_v27 }
  0xb5   : > { %v356_v46 = vmax.f32 %v348_v40, 0.0  ;;  %v358_v47 = vmax.f32 %v350_v41, 0.0 }
  0xb6   : > { %v353_v34 = vmax.f32 %v345_v28, 0.0  ;;  %v355_v35 = vmax.f32 %v347_v29, 0.0 }
  0xb8   : > { %v500_v36 = vpack.c.bf16 %v353_v34, %v352_v32  ;;  %v505_v37 = vpack.c.bf16 %v355_v35, %v354_v33  ;;  %v320_v38 = vpop.f32.mrf.mxu2  ;;  %v325_v39 = vpop.f32.mrf.mxu3 }
  0xb9   : > { %v337_v42 = vmul.f32 %v549_v16, %v320_v38  ;;  %v339_v43 = vmul.f32 %v549_v16, %v325_v39 }
  0xba   : > { %501 = vst [vmem:[%s199_s17] sm:$0xff] %v500_v36  }
  0xbb   : > { %517 = vst [vmem:[%s199_s17 + $0x8] sm:$0xff] %v505_v37   ;;  %v349_v44 = vadd.f32 %v550_v18, %v337_v42  ;;  %v351_v45 = vadd.f32 %v550_v18, %v339_v43 }
  0xbd   : > { %v357_v48 = vmax.f32 %v349_v44, 0.0  ;;  %v359_v49 = vmax.f32 %v351_v45, 0.0 }
  0xbf   : > { %v510_v50 = vpack.c.bf16 %v357_v48, %v356_v46  ;;  %v515_v51 = vpack.c.bf16 %v359_v49, %v358_v47 }
  0xc1   : > { %518 = vst [vmem:[%s199_s17 + $0x10] sm:$0xff] %v510_v50  }
  0xc2   : > { %519 = vst [vmem:[%s199_s17 + $0x18] sm:$0xff] %v515_v51  }
  0xc3 PF: > { %s14_s15 = sadd.s32 1, %s557_s15  }
  0xc4   : > { %p11_p4 = scmp.ge.s32.totalorder %s14_s15, 4  }
  0xc6   :  { %13 = sbr.rel (!%p11_p4) target bundleno = 1 (0x1), region = 66 }

</bundles_post_ra>
